<compile_context>
chip_gen: v7x
topology: tpu7x:2x2x1
jax: 0.10.0
libtpu: 0.0.40
codegen_flags: <defaults>
</compile_context>

<pallas_src>
import functools

import jax
import jax.numpy as jnp
from jax import lax
from jax.experimental import pallas as pl
from jax.experimental.pallas import tpu as pltpu


def _round_up(x, m):
    return (x + m - 1) // m * m


def _quadratic_decoder_kernel(drug_ref, disease_ref, w_ref, out_ref, *, reduce_dtype):
    # drug_ref / disease_ref: (tm, D) streamed dtype; w_ref: (D, D) f32;
    # out_ref: (1, tm) f32.
    drug = drug_ref[...].astype(jnp.float32)
    disease = disease_ref[...].astype(jnp.float32)

    # First matmul: K = N = D (tiny) — free filler under the DMA; f32 acc.
    proj = jnp.dot(drug, w_ref[...], preferred_element_type=jnp.float32)   # (tm, D)
    prod = proj * disease                                                  # VPU (tm, D)

    # Lane-dense reduction over D: ones(1, D) contracted with prod(tm, D) on
    # the last axis -> (1, tm).  `prod` is the MXU stationary operand here, so
    # push it in the streamed dtype (bf16 when inputs are bf16) to avoid
    # f32-emulation weight passes; accumulation stays f32 either way.
    ones_row = jnp.ones((1, prod.shape[1]), dtype=reduce_dtype)
    s = lax.dot_general(ones_row, prod.astype(reduce_dtype),
                        dimension_numbers=(((1,), (1,)), ((), ())),
                        preferred_element_type=jnp.float32)                # (1, tm)

    # sigmoid in f32 (exp on the EUP slot).
    out_ref[...] = (1.0 / (1.0 + jnp.exp(-s))).astype(out_ref.dtype)


def _derive_row_tile(D, in_dtype_bytes, vmem_budget_bytes):
    """Rows per grid step that fit the VMEM budget, lane/sublane aligned."""
    d_lanes = _round_up(D, 128)                       # lane padding of the last dim
    # Per-row VMEM:
    #   2 input streams x 2 pipeline buffers x d_lanes x in_dtype_bytes
    # + up to 4 live f32 (tm, d_lanes) intermediates (drug/disease casts, proj, prod)
    # + (1, tm) f32 output, double buffered.
    per_row = 2 * 2 * d_lanes * in_dtype_bytes + 4 * d_lanes * 4 + 2 * 4
    # Resident W: constant index_map still allocates two f32 buffers.
    fixed = 2 * _round_up(D, 8) * _round_up(D, 128) * 4
    tm = (vmem_budget_bytes - fixed) // per_row
    return max(128, (tm // 128) * 128)


def quadratic_decoder(drug_embs, disease_embs, scoring, *,
                      max_rows_per_step=None,
                      vmem_budget_bytes=24 * 1024 * 1024):
    """Pallas implementation of QuadraticDecoder.forward.

    drug_embs, disease_embs: (N, D) — f32 or bf16 (bf16 halves HBM traffic).
    scoring: (D, D), kept in f32 (matches the PyTorch module).
    Returns f32 scores of shape (N,).
    """
    N, D = drug_embs.shape
    assert disease_embs.shape == (N, D)
    assert scoring.shape == (D, D)
    assert drug_embs.dtype == disease_embs.dtype

    in_dtype = drug_embs.dtype
    scoring = scoring.astype(jnp.float32)             # W stays f32 (reference numerics)
    # Only push the reduction's stationary operand in bf16 when the inputs
    # already are bf16 (the pure-f32 path keeps full precision).
    reduce_dtype = jnp.bfloat16 if in_dtype == jnp.bfloat16 else jnp.float32

    in_bytes = drug_embs.dtype.itemsize
    tm_budget = _derive_row_tile(D, in_bytes, vmem_budget_bytes)
    if max_rows_per_step is not None:
        tm_budget = max(128, min(tm_budget, _round_up(max_rows_per_step, 128)))

    if N <= 512:
        # Tiny batch: one full-array block (full-dim exemption to (8,128)).
        tm_eff = N
        grid_steps = 1
    else:
        # Even number of similar-sized steps so both v7x TensorCores get work.
        n_steps = pl.cdiv(N, tm_budget)
        n_steps = max(2, n_steps + (n_steps % 2))
        tm_eff = _round_up(pl.cdiv(N, n_steps), 128)
        grid_steps = pl.cdiv(N, tm_eff)

    # Many short steps: deepen the row-stream pipeline to hide per-step overhead.
    row_buffers = 3 if (grid_steps >= 4 and tm_eff <= 2048) else None

    def _row_spec():
        idx = lambda i: (i, 0)
        if row_buffers is not None and hasattr(pl, "Buffered"):
            try:
                return pl.BlockSpec((tm_eff, D), idx,
                                    pipeline_mode=pl.Buffered(row_buffers))
            except TypeError:
                pass  # older API without pipeline_mode — fall back to default
        return pl.BlockSpec((tm_eff, D), idx)

    kernel = functools.partial(_quadratic_decoder_kernel, reduce_dtype=reduce_dtype)

    out = pl.pallas_call(
        kernel,
        out_shape=jax.ShapeDtypeStruct((1, N), jnp.float32),
        grid_spec=pltpu.PrefetchScalarGridSpec(
            num_scalar_prefetch=0,
            grid=(grid_steps,),
            in_specs=[
                _row_spec(),                               # drug rows stream
                _row_spec(),                               # disease rows stream
                # Resident f32 scoring matrix (constant index_map -> no re-DMA).
                # TODO(synk): for large D move W to memory_space=pl.ANY + one-time
                # copy into VMEM scratch to drop the duplicate pipeline buffer.
                pl.BlockSpec((D, D), lambda i: (0, 0)),
            ],
            out_specs=pl.BlockSpec((1, tm_eff), lambda i: (0, i)),  # lane-dense slab
        ),
        compiler_params=pltpu.CompilerParams(
            dimension_semantics=("parallel",),     # megacore split on v7x
            vmem_limit_bytes=32 * 1024 * 1024,     # fits v5e/v6e and v7x's 64 MiB part
        ),
    )(drug_embs, disease_embs, scoring)
    return out[0]  # (N,)


def _reference(drug, disease, scoring):
    drug = drug.astype(jnp.float32)
    disease = disease.astype(jnp.float32)
    s = jnp.sum(jnp.dot(drug, scoring, precision=lax.Precision.HIGHEST) * disease,
                axis=1)
    return jax.nn.sigmoid(s)


if __name__ == "__main__":
    D = 32
    key = jax.random.PRNGKey(0)
    k1, k2, k3, k4, k5 = jax.random.split(key, 5)

    # deterministic "torch.randn(embed_dim, embed_dim)" equivalent
    scoring = jax.random.normal(k3, (D, D), dtype=jnp.float32)

    # --- small case (module-scale shapes): single full-array block ---
    N = 8
    drug = jax.random.normal(k1, (N, D), dtype=jnp.float32)
    disease = jax.random.normal(k2, (N, D), dtype=jnp.float32)
    scores = jax.block_until_ready(quadratic_decoder(drug, disease, scoring))
    ref = _reference(drug, disease, scoring)
    assert scores.shape == (N,)
    assert jnp.allclose(scores, ref, atol=2e-3, rtol=2e-3), (scores, ref)

    # --- ragged multi-step case: even grid split + deeper row-stream pipeline ---
    N2 = 2000
    drug2 = jax.random.normal(k4, (N2, D), dtype=jnp.float32)
    disease2 = jax.random.normal(k5, (N2, D), dtype=jnp.float32)
    scores2 = jax.block_until_ready(
        quadratic_decoder(drug2, disease2, scoring, max_rows_per_step=512))
    ref2 = _reference(drug2, disease2, scoring)
    assert scores2.shape == (N2,)
    assert jnp.allclose(scores2, ref2, atol=2e-3, rtol=2e-3)

    # --- bf16 streaming path (half HBM traffic; f32 W, f32 accumulate/sigmoid) ---
    drug_bf = drug2.astype(jnp.bfloat16)
    disease_bf = disease2.astype(jnp.bfloat16)
    scores_bf = jax.block_until_ready(quadratic_decoder(drug_bf, disease_bf, scoring))
    ref_bf = _reference(drug_bf, disease_bf, scoring)
    assert jnp.allclose(scores_bf, ref_bf, atol=3e-2, rtol=3e-2)

    print("KERNEL_OK")
</pallas_src>

<mosaic_0001>
module attributes {stable_mosaic.version = 11 : i64} {
  func.func @_quadratic_decoder_kernel(%arg0: i32, %arg1: memref<8x32xf32, #tpu.memory_space<vmem>>, %arg2: memref<8x32xf32, #tpu.memory_space<vmem>>, %arg3: memref<32x32xf32, #tpu.memory_space<vmem>>, %arg4: memref<1x8xf32, #tpu.memory_space<vmem>>) attributes {dimension_semantics = [#tpu.dimension_semantics<parallel>], iteration_bounds = array<i64: 1>, scalar_prefetch = 0 : i64, scratch_operands = 0 : i64, tpu.core_type = #tpu.core_type<tc>, window_params = [{transform_indices = @transform_0, window_bounds = array<i64: 8, 32>}, {transform_indices = @transform_1, window_bounds = array<i64: 8, 32>}, {pipeline_mode = #tpu.pipeline_mode<synchronous>, transform_indices = @transform_2, window_bounds = array<i64: 32, 32>}, {transform_indices = @transform_3, window_bounds = array<i64: 1, 8>}]} {
    %c0 = arith.constant 0 : index
    %c0_0 = arith.constant 0 : index
    %0 = vector.load %arg1[%c0, %c0_0] : memref<8x32xf32, #tpu.memory_space<vmem>>, vector<8x32xf32>
    %c0_1 = arith.constant 0 : index
    %c0_2 = arith.constant 0 : index
    %1 = vector.load %arg2[%c0_1, %c0_2] : memref<8x32xf32, #tpu.memory_space<vmem>>, vector<8x32xf32>
    %c0_3 = arith.constant 0 : index
    %c0_4 = arith.constant 0 : index
    %2 = vector.load %arg3[%c0_3, %c0_4] : memref<32x32xf32, #tpu.memory_space<vmem>>, vector<32x32xf32>
    %cst = arith.constant dense<0.000000e+00> : vector<8x32xf32>
    %3 = tpu.matmul %0, %2, %cst {dimension_numbers = #tpu.dot_dimension_numbers<[1], [0], [0], [1], [0, 0, 1, 1], [], []>} : vector<8x32xf32>, vector<32x32xf32>, vector<8x32xf32> -> vector<8x32xf32>
    %4 = arith.mulf %3, %1 : vector<8x32xf32>
    %cst_5 = arith.constant 1.000000e+00 : f32
    %5 = vector.broadcast %cst_5 : f32 to vector<1x32xf32>
    %cst_6 = arith.constant dense<0.000000e+00> : vector<1x8xf32>
    %6 = tpu.matmul %5, %4, %cst_6 {dimension_numbers = #tpu.dot_dimension_numbers<[1], [1], [0], [0], [0, 0, 1, 0], [], []>} : vector<1x32xf32>, vector<8x32xf32>, vector<1x8xf32> -> vector<1x8xf32>
    %cst_7 = arith.constant 0.000000e+00 : f32
    %7 = vector.broadcast %cst_7 : f32 to vector<1x8xf32>
    %8 = arith.subf %7, %6 : vector<1x8xf32>
    %9 = math.exp %8 : vector<1x8xf32>
    %cst_8 = arith.constant 1.000000e+00 : f32
    %10 = vector.broadcast %cst_8 : f32 to vector<1x8xf32>
    %11 = arith.addf %10, %9 : vector<1x8xf32>
    %cst_9 = arith.constant 1.000000e+00 : f32
    %12 = vector.broadcast %cst_9 : f32 to vector<1x8xf32>
    %13 = arith.divf %12, %11 : vector<1x8xf32>
    %c0_10 = arith.constant 0 : index
    %c0_11 = arith.constant 0 : index
    %14 = vector.load %arg4[%c0_10, %c0_11] : memref<1x8xf32, #tpu.memory_space<vmem>>, vector<1x8xf32>
    tpu.vector_store %arg4[%c0_10, %c0_11], %13 {strides = array<i32>} : memref<1x8xf32, #tpu.memory_space<vmem>>, vector<1x8xf32>,
    return
  }
  func.func @transform_0(%arg0: i32) -> (i32, i32) {
    %c0_i32 = arith.constant 0 : i32
    %c0_i32_0 = arith.constant 0 : i32
    return %arg0, %c0_i32 : i32, i32
  }
  func.func @transform_1(%arg0: i32) -> (i32, i32) {
    %c0_i32 = arith.constant 0 : i32
    %c0_i32_0 = arith.constant 0 : i32
    return %arg0, %c0_i32 : i32, i32
  }
  func.func @transform_2(%arg0: i32) -> (i32, i32) {
    %c0_i32 = arith.constant 0 : i32
    %c0_i32_0 = arith.constant 0 : i32
    %c0_i32_1 = arith.constant 0 : i32
    return %c0_i32, %c0_i32_0 : i32, i32
  }
  func.func @transform_3(%arg0: i32) -> (i32, i32) {
    %c0_i32 = arith.constant 0 : i32
    %c0_i32_0 = arith.constant 0 : i32
    return %c0_i32, %arg0 : i32, i32
  }
}

</mosaic_0001>

<bundles_post_ra>
// kernel: tpu_custom_call.1
= control target key start
LH: loop header
LB: loop body
LE: loop exit
PB: predicated region body
PF: predicated region fallthrough
CT: control target
= control target key end

     0   :  { %8 = vsyncpa [#allocation3], 0  ;;  %s451_s0 = inlined_call_operand.hbm [shape: f32[8,32], index: 0, kind: input, shape index: {}]   ;;  %s452_s1 = inlined_call_operand.hbm [shape: f32[8,32], index: 1, kind: input, shape index: {}]   ;;  %s453_s2 = inlined_call_operand.hbm [shape: f32[32,32], index: 2, kind: input, shape index: {}]   ;;  %s454_s3 = inlined_call_operand.hbm [shape: f32[1,8], index: 3, kind: output, shape index: {}]  }
   0x1   :  { %9 = vsyncpa [#allocation6], 0 }
   0x2   :  { %10 = vsyncpa [#allocation4], 0  ;;  %s373_s12 = smov [#allocation5]   ;;  %s374_s14 = smov [#allocation2]  }
   0x3   :  { %s27_s13 = sshll.u32 %s373_s12, 4  ;;  %s17_s15 = sshll.u32 %s374_s14, 4  ;;  %s28_s13 = int_to_ptr.vmem [resolvable:$true] %s27_s13  ;;  %s18_s15 = int_to_ptr.vmem [resolvable:$true] %s17_s15 }
   0x4   :  { %s279_s18 = scalar_lea.hbm %s452_s1, 128 }
   0x5   :  { %p280_p0 = scmp.ne.s32.totalorder %s452_s1, %s279_s18  ;;  %p283_p1 = scmp.lt.u32.totalorder %s279_s18, %s452_s1 }
   0x7   :  { %p285_p2 = pnand %p283_p1, %p280_p0 }
   0x9   :  { %288 = shalt.err (!%p285_p2)
}
   0xa   :  { %s289_s23 = scalar_lea.vmem %s28_s13, 128  ;;  %p294_p4 = scmp.lt.s32.totalorder %s28_s13, %s28_s13 }
   0xb   :  { %p290_p3 = scmp.ne.s32.totalorder %s28_s13, %s289_s23  ;;  %p295_p5 = scmp.lt.s32.totalorder %s289_s23, %s289_s23 }
   0xd   :  { %p296_p6 = por %p295_p5, %p294_p4 }
   0xf   :  { %p297_p7 = pnand %p296_p6, %p290_p3 }
  0x11   :  { %300 = shalt.err (!%p297_p7)
}
  0x12   :  { %30 = dma.hbm_to_vmem [thread:$0]  %s452_s1, 128, %s28_s13, [#allocation6]  }
  0x13   :  { %s301_s28 = scalar_lea.hbm %s451_s0, 128 }
  0x14   :  { %p302_p8 = scmp.ne.s32.totalorder %s451_s0, %s301_s28  ;;  %p305_p9 = scmp.lt.u32.totalorder %s301_s28, %s451_s0 }
  0x16   :  { %p307_p10 = pnand %p305_p9, %p302_p8 }
  0x18   :  { %310 = shalt.err (!%p307_p10)
}
  0x19   :  { %s311_s6 = scalar_lea.vmem %s18_s15, 128  ;;  %p316_p12 = scmp.lt.s32.totalorder %s18_s15, %s18_s15 }
  0x1a   :  { %p312_p11 = scmp.ne.s32.totalorder %s18_s15, %s311_s6  ;;  %p317_p13 = scmp.lt.s32.totalorder %s311_s6, %s311_s6 }
  0x1c   :  { %p318_p0 = por %p317_p13, %p316_p12 }
  0x1e   :  { %p319_p1 = pnand %p318_p0, %p312_p11 }
  0x20   :  { %322 = shalt.err (!%p319_p1)
}
  0x21   :  { %20 = dma.hbm_to_vmem [thread:$0]  %s451_s0, 128, %s18_s15, [#allocation3]  }
  0x22   :  { %s375_s8 = smov [#allocation7]   ;;  %s323_s12 = scalar_lea.hbm %s453_s2, 512 }
  0x23   :  { %s36_s9 = sshll.u32 %s375_s8, 4  ;;  %p324_p2 = scmp.ne.s32.totalorder %s453_s2, %s323_s12  ;;  %s37_s9 = int_to_ptr.vmem [resolvable:$true] %s36_s9 }
  0x24   :  { %p327_p3 = scmp.lt.u32.totalorder %s323_s12, %s453_s2 }
  0x26   :  { %p329_p4 = pnand %p327_p3, %p324_p2 }
  0x28   :  { %332 = shalt.err (!%p329_p4)
}
  0x29   :  { %s333_s18 = scalar_lea.vmem %s37_s9, 512  ;;  %p338_p6 = scmp.lt.s32.totalorder %s37_s9, %s37_s9 }
  0x2a   :  { %p334_p5 = scmp.ne.s32.totalorder %s37_s9, %s333_s18  ;;  %p339_p7 = scmp.lt.s32.totalorder %s333_s18, %s333_s18 }
  0x2c   :  { %p340_p8 = por %p339_p7, %p338_p6 }
  0x2e   :  { %p341_p9 = pnand %p340_p8, %p334_p5 }
  0x30   :  { %344 = shalt.err (!%p341_p9)
}
  0x31   :  { %s376_s0 = smov 128   ;;  %s377_s15 = smov 8  }
  0x32   :  { %42 = dma.hbm_to_vmem [thread:$0]  %s453_s2, 512, %s37_s9, [#allocation6], %s376_s0, %s376_s0, %s377_s15  }
  0x33   :  { %367 = dma.done.wait [#allocation3], 128  }
  0x34   :  { %368 = vsyncadd [#allocation3], 4294967168 }
  0x35   :  { %369 = dma.done.wait [#allocation6], 640  }
  0x36   :  { %370 = vsyncadd [#allocation6], 4294966656  ;;  %v378_v0 = vmov 0.0|0.0   ;;  %vm379_vm0 = vmmov 0   ;;  %v380_v1 = vmov 0.0   ;;  %v54_v2 = vld [vmem:[#allocation7] sm:$0xff] }
  0x37   :  { %259 = vmatprep.subr.bf16.mxu0 %v378_v0  ;;  %251 = vmatprep.mubr.msk.f32.mxu0 %vm379_vm0, %v380_v1  ;;  %v55_v3 = vld [vmem:[#allocation7 + $0x8] sm:$0xff]  ;;  %v56_v4 = vld [vmem:[#allocation7 + $0x10] sm:$0xff]  ;;  %v57_v6 = vld [vmem:[#allocation7 + $0x18] sm:$0xff]  ;;  %vm58_vm1 = vcmask 261120   ;;  %v381_v13 = vmov 1.0   ;;  %s382_s2 = smov [#allocation8]  }
  0x38   :  { %254 = vmatprep.subr.mxu1 %v380_v1  ;;  %256 = vmatprep.mubr.msk.f32.mxu1 %vm379_vm0, %v380_v1  ;;  %v260_v5 = vpack.c.bf16 %v55_v3, %v54_v2  ;;  %v263_v7 = vpack.c.bf16 %v57_v6, %v56_v4  ;;  %v52_v8 = vld [vmem:[#allocation2] sm:$0xff]  ;;  %v53_v9 = vld [vmem:[#allocation5] sm:$0xff]  ;;  %s223_s21 = sshll.u32 %s382_s2, 4  ;;  %vm215_vm2 = vcmask 57344   ;;  %s224_s21 = int_to_ptr.vmem [resolvable:$true] %s223_s21 }
  0x39   :  { %s345_s22 = scalar_lea.vmem %s224_s21, 16  ;;  %s349_s23 = scalar_lea.vmem %s224_s21, 32 }
  0x3a   :  { %261 = vmatpush3.bf16.msra.mxu0 %v260_v5  ;;  %p346_p10 = scmp.ne.s32.totalorder %s224_s21, %s345_s22  ;;  %p350_p11 = scmp.lt.s32.totalorder %s224_s21, %s224_s21 }
  0x3b   :  { %262 = vmatprep.subr.bf16.mxu0 %v378_v0  ;;  %p351_p12 = scmp.lt.s32.totalorder %s349_s23, %s345_s22 }
  0x3d   :  { %p352_p13 = por %p351_p12, %p350_p11 }
  0x3e   :  { %264 = vmatpush3.bf16.msra.mxu0 %v263_v7 }
  0x3f   :  { %p353_p0 = pnand %p352_p13, %p346_p10 }
  0x41   :  { %252 = vmatmul.mubr.msk.f32.vlgmr.msra.gmra.mrb[0].mxu0 %vm58_vm1, %v52_v8 }
 0x114   :  { %v128_v10 = vpop.f32.mrb[0].mxu0 }
 0x115   :  { %v132_v11 = vmul.f32 %v128_v10, %v53_v9  ;;  %v253_v12 = vpop.f32.mrb[1].mxu0 }
 0x117   :  { %255 = vmatpush3.xpose.msk.msra.mxu1 %vm58_vm1, %v132_v11 }
 0x11a   :  { %257 = vmatmul.mubr.msk.f32.vlgmr.msra.gmra.mrb[0].mxu1 %vm58_vm1, %v381_v13 }
 0x1ed   :  { %v205_v14 = vpop.f32.mrb[0].mxu1 }
 0x1ee   :  { %v209_v15 = vsub.f32 0.0, %v205_v14  ;;  %v258_v16 = vpop.f32.mrb[1].mxu1 }
 0x1f0   :  { %v210_v17 = vmul.f32 1.442695, %v209_v15 }
 0x1f2   :  { %275 = vpow2.f32 %v210_v17 }
 0x1fc   :  { %v276_v18 = vpop.eup %275 }
 0x1fd   :  { %v212_v19 = vadd.f32 1.0, %v276_v18 }
 0x1ff   :  { %277 = vrcp.f32 %v212_v19 }
 0x209   :  { %v278_v20 = vpop.eup %277 }
 0x20a   :  { %216 = vst.msk [vmem:[#allocation8] sm:$0x1] %vm215_vm2, %v278_v20 }
 0x20b   :  { %356 = shalt.err (!%p353_p0)
}
 0x20c   :  { %s357_s26 = scalar_lea.hbm %s454_s3, 16 }
 0x20d   :  { %p358_p1 = scmp.ne.s32.totalorder %s454_s3, %s357_s26  ;;  %p361_p2 = scmp.lt.u32.totalorder %s357_s26, %s454_s3 }
 0x20f   :  { %p363_p3 = pnand %p361_p2, %p358_p1 }
 0x211   :  { %366 = shalt.err (!%p363_p3)
}
 0x212   :  { %226 = dma.vmem_to_hbm [thread:$0]  %s224_s21, 16, %s454_s3, [#allocation4]  }
 0x213   :  { %371 = dma.done.wait [#allocation4], 16  }
 0x214   :  { %372 = vsyncadd [#allocation4], 4294967280 }
 0x215   :  { %230 = vsyncpa [#allocation3], 1 }
 0x216   :  { %231 = vsyncpa [#allocation6], 1 }
 0x217   :  { %232 = vsyncpa [#allocation4], 1 }

</bundles_post_ra>
